<compile_context>
chip_gen: v7x
topology: tpu7x:2x2x1
jax: 0.10.0
libtpu: 0.0.40
codegen_flags: <defaults>
</compile_context>

<pallas_src>
import functools
import math

import jax
import jax.numpy as jnp
from jax.experimental import pallas as pl
from jax.experimental.pallas import tpu as pltpu

MAX_FLOW = 400.0


# --------------------------------- kernel ---------------------------------
def _raft_loss_kernel(*refs, n_preds, max_flow, total_h, tile_h, use_16bit_ew):
    """Grid axis 0 iterates over H tiles ("parallel").

    refs = (pred_ref_0 .. pred_ref_{N-1}, gt_ref, vm_ref, out_ref)
      pred_ref_i : (B, 2, TH, W)   H-tile of prediction i (native dtype)
      gt_ref     : (B, 2, TH, W)   ground-truth flow tile (native dtype)
      vm_ref     : (B, TH, W)      raw validity-mask tile
      out_ref    : (N+5, B, W)     per-tile partials, reduced over TH:
                     rows 0..N-1 : masked-L1 sums per prediction
                     row  N      : valid-pixel count
                     row  N+1    : sum(EPE) over valid pixels (last prediction)
                     rows N+2..4 : counts of EPE<1 / EPE<3 / EPE<5
    """
    pred_refs = refs[:n_preds]
    gt_ref, vm_ref, out_ref = refs[n_preds:]

    # GT channels loaded per channel straight from the Ref (no full-block temporary).
    gt_u_nat = gt_ref[:, 0, :, :]
    gt_v_nat = gt_ref[:, 1, :, :]
    gt_u = gt_u_nat.astype(jnp.float32)                 # (B, TH, W)
    gt_v = gt_v_nat.astype(jnp.float32)
    vm = vm_ref[...].astype(jnp.float32)                # (B, TH, W)

    # valid = (vm >= 0.5) & (|flow_gt| < max_flow)  -- sqrt-free squared compare,
    # computed once per tile and reused for all N predictions.
    mag2 = gt_u * gt_u + gt_v * gt_v
    valid = jnp.logical_and(vm >= 0.5, mag2 < max_flow * max_flow)   # bool (B,TH,W)

    if total_h % tile_h != 0:
        # Ragged H: the last tile reads rows past H (garbage). Fold a row-validity
        # mask into `valid`; boolean `where` masking below guarantees garbage
        # (possibly NaN/Inf) never reaches the sums.
        row = jax.lax.broadcasted_iota(jnp.int32, valid.shape, 1)
        row = row + pl.program_id(0) * tile_h
        valid = jnp.logical_and(valid, row < total_h)

    valid_f = valid.astype(jnp.float32)
    zero_f = jnp.zeros_like(valid_f)

    # Elementwise (sub/abs/add) stage dtype: packed bf16 when all inputs are 16-bit
    # floats (v6e/v7x VPUs, 2 elems/lane); sums always accumulate in f32.
    gt_u_ew = gt_u_nat if use_16bit_ew else gt_u
    gt_v_ew = gt_v_nat if use_16bit_ew else gt_v

    rows = []
    for i, p_ref in enumerate(pred_refs):
        pu = p_ref[:, 0, :, :]
        pv = p_ref[:, 1, :, :]
        if use_16bit_ew:
            du = pu - gt_u_ew
            dv = pv - gt_v_ew
        else:
            du = pu.astype(jnp.float32) - gt_u_ew
            dv = pv.astype(jnp.float32) - gt_v_ew

        # Masked L1, reduced over the tile-H axis (W stays on lanes), f32 accumulate.
        l1 = jnp.abs(du) + jnp.abs(dv)
        l1 = jnp.where(valid, l1, jnp.zeros_like(l1))
        rows.append(jnp.sum(l1, axis=1, dtype=jnp.float32))          # (B, W)

        if i == n_preds - 1:
            # EPE metrics for the last prediction only. px counters compare the
            # squared distance, so the single sqrt only feeds the EPE sum.
            if use_16bit_ew:
                du32 = pu.astype(jnp.float32) - gt_u
                dv32 = pv.astype(jnp.float32) - gt_v
            else:
                du32, dv32 = du, dv
            d2 = du32 * du32 + dv32 * dv32
            epe = jnp.sqrt(d2)
            rows.append(jnp.sum(valid_f, axis=1))                            # valid count
            rows.append(jnp.sum(jnp.where(valid, epe, 0.0), axis=1))         # sum(EPE)
            rows.append(jnp.sum(jnp.where(d2 < 1.0, valid_f, zero_f), axis=1))   # EPE < 1
            rows.append(jnp.sum(jnp.where(d2 < 9.0, valid_f, zero_f), axis=1))   # EPE < 3
            rows.append(jnp.sum(jnp.where(d2 < 25.0, valid_f, zero_f), axis=1))  # EPE < 5

    # One (N+5, B, W) slab store per tile: single output DMA stream instead of
    # N+5 separate sublane-masked row stores spread over two output buffers.
    out_ref[...] = jnp.stack(rows, axis=0)


# ------------------------------ tiling helpers ------------------------------
def _cdiv(a, b):
    return -(-a // b)


def _sublane_step(dtype):
    # Sublane granularity for the second-minor block dim: f32 -> 8, bf16 -> 16, int8 -> 32.
    return {1: 32, 2: 16, 4: 8}.get(jnp.dtype(dtype).itemsize, 8)


def _vmem_capacity_bytes():
    try:
        return int(pltpu.get_tpu_info().vmem_capacity_bytes)
    except Exception:
        return 64 << 20    # conservative fallback (v7x per-core size)


def _pick_tile_h(h, step, working_set, budget_bytes, min_grid_steps):
    """Largest H tile (multiple of `step`) whose working set fits the budget while
    keeping >= min_grid_steps grid steps (DMA overlap / megacore sharding), preferring
    an even tile count (balanced split across v7x's 2 TensorCores)."""
    h_pad = _cdiv(h, step) * step
    cands = list(range(step, h_pad + 1, step))
    fitting = [t for t in cands if working_set(t) <= budget_bytes] or [step]
    n_tiles = lambda t: _cdiv(h, t)
    pool = [t for t in fitting if n_tiles(t) >= min_grid_steps] or fitting
    even = [t for t in pool if n_tiles(t) % 2 == 0]
    return max(even or pool)


# --------------------------------- wrapper ---------------------------------
def raft_loss(flow_preds, flow_gt, valid_mask, *, gamma=0.8, max_flow=MAX_FLOW,
              tile_h=None, min_grid_steps=8, core_parallel=False):
    """Pallas implementation of RaftLoss.forward.

    Args:
      flow_preds: list of arrays, each (B, 2, H, W) (any float dtype; no host-side cast)
      flow_gt:    (B, 2, H, W)
      valid_mask: (B, H, W)
    Returns:
      (total_flow_loss scalar, metrics dict) — same semantics as the PyTorch module.
    """
    flow_preds = list(flow_preds)
    n = len(flow_preds)
    b, c, h, w = flow_gt.shape
    assert c == 2, flow_gt.shape
    assert valid_mask.shape == (b, h, w), valid_mask.shape
    for p in flow_preds:
        assert p.shape == (b, 2, h, w), p.shape

    # Sublane step = lcm over ALL inputs so mixed bf16/f32 inputs never get an
    # illegal block granularity on any BlockSpec.
    step = 1
    for x in flow_preds + [flow_gt, valid_mask]:
        s = _sublane_step(x.dtype)
        step = step * s // math.gcd(step, s)

    # Generation-aware VMEM budget (~50% of physical: ~64 MiB on v5e/v6e, ~32 MiB on v7x).
    vmem_cap = _vmem_capacity_bytes()
    budget = max(8 << 20, vmem_cap // 2)

    pred_isz = [jnp.dtype(p.dtype).itemsize for p in flow_preds]
    gt_isz = jnp.dtype(flow_gt.dtype).itemsize
    vm_isz = jnp.dtype(valid_mask.dtype).itemsize

    def working_set(th):
        rows = b * th * w
        # double-buffered pipeline blocks (native dtypes) + tiny output block ...
        in_blocks = sum(2 * rows * s for s in pred_isz) + 2 * rows * gt_isz + rows * vm_isz
        out_block = (n + 5) * b * w * 4
        # ... plus f32 in-kernel temporaries (gt_u/gt_v/valid live across the unrolled
        # N-prediction loop, plus the per-iteration du/dv/l1/d2/epe chain).
        tmp_f32 = 8 * rows * 4
        return 2 * (in_blocks + out_block) + tmp_f32

    if tile_h is None:
        tile_h = _pick_tile_h(h, step, working_set, budget, min_grid_steps)
    assert tile_h % step == 0, (tile_h, step)
    num_tiles = _cdiv(h, tile_h)

    # Explicit scoped-VMEM limit matching the tile picker's budget (+25% headroom),
    # capped below physical VMEM so the tile is legal on every generation.
    vmem_limit = min(int(vmem_cap * 0.95),
                     max(32 << 20, int(1.25 * working_set(tile_h)) + (4 << 20)))

    all_dts = {jnp.dtype(p.dtype) for p in flow_preds} | {jnp.dtype(flow_gt.dtype)}
    only_dt = next(iter(all_dts))
    use_16bit_ew = (len(all_dts) == 1 and only_dt.itemsize == 2
                    and jnp.issubdtype(only_dt, jnp.floating))

    kernel = functools.partial(
        _raft_loss_kernel, n_preds=n, max_flow=float(max_flow),
        total_h=h, tile_h=tile_h, use_16bit_ew=use_16bit_ew)

    pred_spec = pl.BlockSpec((b, 2, tile_h, w), lambda t: (0, 0, t, 0))
    vm_spec = pl.BlockSpec((b, tile_h, w), lambda t: (0, t, 0))
    out_spec = pl.BlockSpec((None, n + 5, b, w), lambda t: (t, 0, 0, 0))

    # Per-tile outputs -> no cross-iteration accumulation -> the spatial axis can be
    # sharded across TensorCores. CORE_PARALLEL makes the v7x 2-TC split explicit.
    tile_sem = pltpu.CORE_PARALLEL if core_parallel else pltpu.PARALLEL

    part = pl.pallas_call(
        kernel,
        out_shape=jax.ShapeDtypeStruct((num_tiles, n + 5, b, w), jnp.float32),
        grid_spec=pltpu.PrefetchScalarGridSpec(
            num_scalar_prefetch=0,
            grid=(num_tiles,),
            in_specs=[pred_spec] * n + [pred_spec, vm_spec],
            out_specs=out_spec,
        ),
        compiler_params=pltpu.CompilerParams(
            dimension_semantics=(tile_sem,),
            vmem_limit_bytes=int(vmem_limit),
        ),
    )(*flow_preds, flow_gt, valid_mask)

    # --- tiny glue: finish the reductions / weighting ---
    sums = jnp.sum(part, axis=(0, 2, 3))                      # (n+5,)
    l1_sums = sums[:n]
    valid_cnt = sums[n]
    epe_sum, cnt1, cnt3, cnt5 = sums[n + 1], sums[n + 2], sums[n + 3], sums[n + 4]

    weights = gamma ** (n - 1 - jnp.arange(n, dtype=jnp.float32))
    # NOTE: like the PyTorch original, divides by the valid-pixel count and yields
    # NaN/Inf if no pixel is valid (precondition: at least one valid GT pixel).
    flow_losses = l1_sums / valid_cnt                         # per-prediction l1_loss_fixed
    total_flow_loss = jnp.sum(weights * flow_losses)

    metrics = {
        "flow_loss": total_flow_loss,
        "epe": epe_sum / valid_cnt,
        "1px": cnt1 / valid_cnt,
        "3px": cnt3 / valid_cnt,
        "5px": cnt5 / valid_cnt,
    }
    return total_flow_loss, metrics


# ------------------------- pure-JAX reference (for checking) -------------------------
def _ref_raft_loss(preds, gt, vm, gamma, max_flow):
    preds = preds.astype(jnp.float32)
    gt = gt.astype(jnp.float32)
    vm = vm.astype(jnp.float32)
    mag = jnp.sqrt(jnp.sum(gt ** 2, axis=1))
    valid = jnp.logical_and(vm >= 0.5, mag < max_flow).astype(jnp.float32)
    n = preds.shape[0]
    total = 0.0
    for i in range(n):
        l1 = jnp.sum(jnp.abs(preds[i] - gt), axis=1)
        total = total + gamma ** (n - i - 1) * jnp.sum(l1 * valid) / jnp.sum(valid)
    epe = jnp.sqrt(jnp.sum((preds[-1] - gt) ** 2, axis=1))
    cnt = jnp.sum(valid)
    metrics = {
        "flow_loss": total,
        "epe": jnp.sum(epe * valid) / cnt,
        "1px": jnp.sum(jnp.where(epe < 1.0, valid, 0.0)) / cnt,
        "3px": jnp.sum(jnp.where(epe < 3.0, valid, 0.0)) / cnt,
        "5px": jnp.sum(jnp.where(epe < 5.0, valid, 0.0)) / cnt,
    }
    return total, metrics


if __name__ == "__main__":
    key = jax.random.PRNGKey(0)
    B, H, W = 2, 16, 16
    N_PRED = 3  # number of intermediate RAFT refinement predictions

    k_gt, k_vm, *k_preds = jax.random.split(key, 2 + N_PRED)
    flow_gt = 5.0 * jax.random.normal(k_gt, (B, 2, H, W), dtype=jnp.float32)
    valid_mask = jax.random.uniform(k_vm, (B, H, W), dtype=jnp.float32)
    flow_preds = [flow_gt + jax.random.normal(kp, (B, 2, H, W), dtype=jnp.float32)
                  for kp in k_preds]

    # 1) f32 inputs, explicit small tile -> multi-step grid path.
    total, metrics = raft_loss(flow_preds, flow_gt, valid_mask, tile_h=8)
    total = jax.block_until_ready(total)
    ref_total, ref_metrics = _ref_raft_loss(jnp.stack(flow_preds), flow_gt,
                                            valid_mask, 0.8, MAX_FLOW)
    assert jnp.allclose(total, ref_total, rtol=1e-5, atol=1e-5), (
        float(total), float(ref_total))
    for k in ref_metrics:
        assert jnp.allclose(metrics[k], ref_metrics[k], rtol=1e-5, atol=1e-5), (
            k, float(metrics[k]), float(ref_metrics[k]))

    # 2) ragged H (H % tile_h != 0) -> masked last tile path.
    H2 = 24
    k2 = jax.random.PRNGKey(1)
    k_gt2, k_vm2, *k_preds2 = jax.random.split(k2, 2 + N_PRED)
    gt2 = 5.0 * jax.random.normal(k_gt2, (B, 2, H2, W), dtype=jnp.float32)
    vm2 = jax.random.uniform(k_vm2, (B, H2, W), dtype=jnp.float32)
    preds2 = [gt2 + jax.random.normal(kp, (B, 2, H2, W), dtype=jnp.float32)
              for kp in k_preds2]
    total2, metrics2 = raft_loss(preds2, gt2, vm2, tile_h=16)
    total2 = jax.block_until_ready(total2)
    ref_total2, ref_metrics2 = _ref_raft_loss(jnp.stack(preds2), gt2, vm2, 0.8, MAX_FLOW)
    assert jnp.allclose(total2, ref_total2, rtol=1e-5, atol=1e-5), (
        float(total2), float(ref_total2))
    for k in ref_metrics2:
        assert jnp.allclose(metrics2[k], ref_metrics2[k], rtol=1e-5, atol=1e-5), (
            k, float(metrics2[k]), float(ref_metrics2[k]))

    # 3) mixed dtypes (bf16 preds + f32 gt/mask): exercises the lcm sublane-step fix;
    #    kernel computes in f32 so it must match the reference on the cast values.
    preds_bf16 = [p.astype(jnp.bfloat16) for p in flow_preds]
    total3, metrics3 = raft_loss(preds_bf16, flow_gt, valid_mask)
    total3 = jax.block_until_ready(total3)
    ref_total3, ref_metrics3 = _ref_raft_loss(
        jnp.stack([p.astype(jnp.float32) for p in preds_bf16]),
        flow_gt, valid_mask, 0.8, MAX_FLOW)
    assert jnp.allclose(total3, ref_total3, rtol=1e-5, atol=1e-5), (
        float(total3), float(ref_total3))
    for k in ref_metrics3:
        assert jnp.allclose(metrics3[k], ref_metrics3[k], rtol=1e-5, atol=1e-5), (
            k, float(metrics3[k]), float(ref_metrics3[k]))

    # 4) all-bf16 inputs: packed 16-bit elementwise stage (v6e/v7x), f32 accumulation.
    total4, metrics4 = raft_loss(
        [p.astype(jnp.bfloat16) for p in flow_preds],
        flow_gt.astype(jnp.bfloat16), valid_mask.astype(jnp.bfloat16))
    total4 = jax.block_until_ready(total4)
    assert bool(jnp.isfinite(total4)), float(total4)
    for k, v in metrics4.items():
        assert bool(jnp.isfinite(jax.block_until_ready(v))), (k, float(v))

    print("KERNEL_OK")
</pallas_src>

<mosaic_0001>
module attributes {stable_mosaic.version = 11 : i64} {
  func.func @_raft_loss_kernel(%arg0: i32, %arg1: memref<2x2x8x16xf32, #tpu.memory_space<vmem>>, %arg2: memref<2x2x8x16xf32, #tpu.memory_space<vmem>>, %arg3: memref<2x2x8x16xf32, #tpu.memory_space<vmem>>, %arg4: memref<2x2x8x16xf32, #tpu.memory_space<vmem>>, %arg5: memref<2x8x16xf32, #tpu.memory_space<vmem>>, %arg6: memref<1x8x2x16xf32, #tpu.memory_space<vmem>>) attributes {dimension_semantics = [#tpu.dimension_semantics<parallel>], iteration_bounds = array<i64: 2>, scalar_prefetch = 0 : i64, scratch_operands = 0 : i64, tpu.core_type = #tpu.core_type<tc>, window_params = [{transform_indices = @transform_0, window_bounds = array<i64: 2, 2, 8, 16>}, {transform_indices = @transform_1, window_bounds = array<i64: 2, 2, 8, 16>}, {transform_indices = @transform_2, window_bounds = array<i64: 2, 2, 8, 16>}, {transform_indices = @transform_3, window_bounds = array<i64: 2, 2, 8, 16>}, {transform_indices = @transform_4, window_bounds = array<i64: 2, 8, 16>}, {transform_indices = @transform_5, window_bounds = array<i64: 1, 8, 2, 16>}]} {
    %c0 = arith.constant 0 : index
    %c0_0 = arith.constant 0 : index
    %c0_1 = arith.constant 0 : index
    %c0_2 = arith.constant 0 : index
    %0 = vector.load %arg4[%c0, %c0_0, %c0_1, %c0_2] : memref<2x2x8x16xf32, #tpu.memory_space<vmem>>, vector<2x1x8x16xf32>
    %1 = vector.shape_cast %0 : vector<2x1x8x16xf32> to vector<2x8x16xf32>
    %c0_3 = arith.constant 0 : index
    %c1 = arith.constant 1 : index
    %c0_4 = arith.constant 0 : index
    %c0_5 = arith.constant 0 : index
    %2 = vector.load %arg4[%c0_3, %c1, %c0_4, %c0_5] : memref<2x2x8x16xf32, #tpu.memory_space<vmem>>, vector<2x1x8x16xf32>
    %3 = vector.shape_cast %2 : vector<2x1x8x16xf32> to vector<2x8x16xf32>
    %c0_6 = arith.constant 0 : index
    %c0_7 = arith.constant 0 : index
    %c0_8 = arith.constant 0 : index
    %4 = vector.load %arg5[%c0_6, %c0_7, %c0_8] : memref<2x8x16xf32, #tpu.memory_space<vmem>>, vector<2x8x16xf32>
    %5 = arith.mulf %1, %1 : vector<2x8x16xf32>
    %6 = arith.mulf %3, %3 : vector<2x8x16xf32>
    %7 = arith.addf %5, %6 : vector<2x8x16xf32>
    %cst = arith.constant 5.000000e-01 : f32
    %8 = vector.broadcast %cst : f32 to vector<2x8x16xf32>
    %9 = arith.cmpf oge, %4, %8 : vector<2x8x16xf32>
    %cst_9 = arith.constant 1.600000e+05 : f32
    %10 = vector.broadcast %cst_9 : f32 to vector<2x8x16xf32>
    %11 = arith.cmpf olt, %7, %10 : vector<2x8x16xf32>
    %12 = arith.andi %9, %11 : vector<2x8x16xi1>
    %13 = arith.extui %12 : vector<2x8x16xi1> to vector<2x8x16xi32>
    %14 = arith.sitofp %13 : vector<2x8x16xi32> to vector<2x8x16xf32>
    %cst_10 = arith.constant 0.000000e+00 : f32
    %15 = vector.broadcast %cst_10 : f32 to vector<2x8x16xf32>
    %c0_11 = arith.constant 0 : index
    %c0_12 = arith.constant 0 : index
    %c0_13 = arith.constant 0 : index
    %c0_14 = arith.constant 0 : index
    %16 = vector.load %arg1[%c0_11, %c0_12, %c0_13, %c0_14] : memref<2x2x8x16xf32, #tpu.memory_space<vmem>>, vector<2x1x8x16xf32>
    %17 = vector.shape_cast %16 : vector<2x1x8x16xf32> to vector<2x8x16xf32>
    %c0_15 = arith.constant 0 : index
    %c1_16 = arith.constant 1 : index
    %c0_17 = arith.constant 0 : index
    %c0_18 = arith.constant 0 : index
    %18 = vector.load %arg1[%c0_15, %c1_16, %c0_17, %c0_18] : memref<2x2x8x16xf32, #tpu.memory_space<vmem>>, vector<2x1x8x16xf32>
    %19 = vector.shape_cast %18 : vector<2x1x8x16xf32> to vector<2x8x16xf32>
    %20 = arith.subf %17, %1 : vector<2x8x16xf32>
    %21 = arith.subf %19, %3 : vector<2x8x16xf32>
    %22 = math.absf %20 : vector<2x8x16xf32>
    %23 = math.absf %21 : vector<2x8x16xf32>
    %24 = arith.addf %22, %23 : vector<2x8x16xf32>
    %cst_19 = arith.constant 0.000000e+00 : f32
    %25 = vector.broadcast %cst_19 : f32 to vector<2x8x16xf32>
    %26 = arith.select %12, %24, %25 : vector<2x8x16xi1>, vector<2x8x16xf32>
    %cst_20 = arith.constant dense<0.000000e+00> : vector<2x16xf32>
    %27 = vector.multi_reduction <add>, %26, %cst_20 [1] : vector<2x8x16xf32> to vector<2x16xf32>
    %c0_21 = arith.constant 0 : index
    %c0_22 = arith.constant 0 : index
    %c0_23 = arith.constant 0 : index
    %c0_24 = arith.constant 0 : index
    %28 = vector.load %arg2[%c0_21, %c0_22, %c0_23, %c0_24] : memref<2x2x8x16xf32, #tpu.memory_space<vmem>>, vector<2x1x8x16xf32>
    %29 = vector.shape_cast %28 : vector<2x1x8x16xf32> to vector<2x8x16xf32>
    %c0_25 = arith.constant 0 : index
    %c1_26 = arith.constant 1 : index
    %c0_27 = arith.constant 0 : index
    %c0_28 = arith.constant 0 : index
    %30 = vector.load %arg2[%c0_25, %c1_26, %c0_27, %c0_28] : memref<2x2x8x16xf32, #tpu.memory_space<vmem>>, vector<2x1x8x16xf32>
    %31 = vector.shape_cast %30 : vector<2x1x8x16xf32> to vector<2x8x16xf32>
    %32 = arith.subf %29, %1 : vector<2x8x16xf32>
    %33 = arith.subf %31, %3 : vector<2x8x16xf32>
    %34 = math.absf %32 : vector<2x8x16xf32>
    %35 = math.absf %33 : vector<2x8x16xf32>
    %36 = arith.addf %34, %35 : vector<2x8x16xf32>
    %cst_29 = arith.constant 0.000000e+00 : f32
    %37 = vector.broadcast %cst_29 : f32 to vector<2x8x16xf32>
    %38 = arith.select %12, %36, %37 : vector<2x8x16xi1>, vector<2x8x16xf32>
    %cst_30 = arith.constant dense<0.000000e+00> : vector<2x16xf32>
    %39 = vector.multi_reduction <add>, %38, %cst_30 [1] : vector<2x8x16xf32> to vector<2x16xf32>
    %c0_31 = arith.constant 0 : index
    %c0_32 = arith.constant 0 : index
    %c0_33 = arith.constant 0 : index
    %c0_34 = arith.constant 0 : index
    %40 = vector.load %arg3[%c0_31, %c0_32, %c0_33, %c0_34] : memref<2x2x8x16xf32, #tpu.memory_space<vmem>>, vector<2x1x8x16xf32>
    %41 = vector.shape_cast %40 : vector<2x1x8x16xf32> to vector<2x8x16xf32>
    %c0_35 = arith.constant 0 : index
    %c1_36 = arith.constant 1 : index
    %c0_37 = arith.constant 0 : index
    %c0_38 = arith.constant 0 : index
    %42 = vector.load %arg3[%c0_35, %c1_36, %c0_37, %c0_38] : memref<2x2x8x16xf32, #tpu.memory_space<vmem>>, vector<2x1x8x16xf32>
    %43 = vector.shape_cast %42 : vector<2x1x8x16xf32> to vector<2x8x16xf32>
    %44 = arith.subf %41, %1 : vector<2x8x16xf32>
    %45 = arith.subf %43, %3 : vector<2x8x16xf32>
    %46 = math.absf %44 : vector<2x8x16xf32>
    %47 = math.absf %45 : vector<2x8x16xf32>
    %48 = arith.addf %46, %47 : vector<2x8x16xf32>
    %cst_39 = arith.constant 0.000000e+00 : f32
    %49 = vector.broadcast %cst_39 : f32 to vector<2x8x16xf32>
    %50 = arith.select %12, %48, %49 : vector<2x8x16xi1>, vector<2x8x16xf32>
    %cst_40 = arith.constant dense<0.000000e+00> : vector<2x16xf32>
    %51 = vector.multi_reduction <add>, %50, %cst_40 [1] : vector<2x8x16xf32> to vector<2x16xf32>
    %52 = arith.mulf %44, %44 : vector<2x8x16xf32>
    %53 = arith.mulf %45, %45 : vector<2x8x16xf32>
    %54 = arith.addf %52, %53 : vector<2x8x16xf32>
    %55 = math.sqrt %54 : vector<2x8x16xf32>
    %cst_41 = arith.constant dense<0.000000e+00> : vector<2x16xf32>
    %56 = vector.multi_reduction <add>, %14, %cst_41 [1] : vector<2x8x16xf32> to vector<2x16xf32>
    %cst_42 = arith.constant 0.000000e+00 : f32
    %57 = vector.broadcast %cst_42 : f32 to vector<2x8x16xf32>
    %58 = arith.select %12, %55, %57 : vector<2x8x16xi1>, vector<2x8x16xf32>
    %cst_43 = arith.constant dense<0.000000e+00> : vector<2x16xf32>
    %59 = vector.multi_reduction <add>, %58, %cst_43 [1] : vector<2x8x16xf32> to vector<2x16xf32>
    %cst_44 = arith.constant 1.000000e+00 : f32
    %60 = vector.broadcast %cst_44 : f32 to vector<2x8x16xf32>
    %61 = arith.cmpf olt, %54, %60 : vector<2x8x16xf32>
    %62 = arith.select %61, %14, %15 : vector<2x8x16xi1>, vector<2x8x16xf32>
    %cst_45 = arith.constant dense<0.000000e+00> : vector<2x16xf32>
    %63 = vector.multi_reduction <add>, %62, %cst_45 [1] : vector<2x8x16xf32> to vector<2x16xf32>
    %cst_46 = arith.constant 9.000000e+00 : f32
    %64 = vector.broadcast %cst_46 : f32 to vector<2x8x16xf32>
    %65 = arith.cmpf olt, %54, %64 : vector<2x8x16xf32>
    %66 = arith.select %65, %14, %15 : vector<2x8x16xi1>, vector<2x8x16xf32>
    %cst_47 = arith.constant dense<0.000000e+00> : vector<2x16xf32>
    %67 = vector.multi_reduction <add>, %66, %cst_47 [1] : vector<2x8x16xf32> to vector<2x16xf32>
    %cst_48 = arith.constant 2.500000e+01 : f32
    %68 = vector.broadcast %cst_48 : f32 to vector<2x8x16xf32>
    %69 = arith.cmpf olt, %54, %68 : vector<2x8x16xf32>
    %70 = arith.select %69, %14, %15 : vector<2x8x16xi1>, vector<2x8x16xf32>
    %cst_49 = arith.constant dense<0.000000e+00> : vector<2x16xf32>
    %71 = vector.multi_reduction <add>, %70, %cst_49 [1] : vector<2x8x16xf32> to vector<2x16xf32>
    %72 = vector.shape_cast %27 : vector<2x16xf32> to vector<1x2x16xf32>
    %73 = vector.shape_cast %39 : vector<2x16xf32> to vector<1x2x16xf32>
    %74 = vector.shape_cast %51 : vector<2x16xf32> to vector<1x2x16xf32>
    %75 = vector.shape_cast %56 : vector<2x16xf32> to vector<1x2x16xf32>
    %76 = vector.shape_cast %59 : vector<2x16xf32> to vector<1x2x16xf32>
    %77 = vector.shape_cast %63 : vector<2x16xf32> to vector<1x2x16xf32>
    %78 = vector.shape_cast %67 : vector<2x16xf32> to vector<1x2x16xf32>
    %79 = vector.shape_cast %71 : vector<2x16xf32> to vector<1x2x16xf32>
    %80 = tpu.concatenate %72, %73, %74, %75, %76, %77, %78, %79 in 0 : vector<1x2x16xf32>, vector<1x2x16xf32>, vector<1x2x16xf32>, vector<1x2x16xf32>, vector<1x2x16xf32>, vector<1x2x16xf32>, vector<1x2x16xf32>, vector<1x2x16xf32> -> vector<8x2x16xf32>
    %c0_50 = arith.constant 0 : index
    %c0_51 = arith.constant 0 : index
    %c0_52 = arith.constant 0 : index
    %c0_53 = arith.constant 0 : index
    %81 = vector.load %arg6[%c0_50, %c0_51, %c0_52, %c0_53] : memref<1x8x2x16xf32, #tpu.memory_space<vmem>>, vector<1x8x2x16xf32>
    %82 = vector.shape_cast %81 : vector<1x8x2x16xf32> to vector<8x2x16xf32>
    %83 = vector.shape_cast %80 : vector<8x2x16xf32> to vector<1x8x2x16xf32>
    tpu.vector_store %arg6[%c0_50, %c0_51, %c0_52, %c0_53], %83 {strides = array<i32>} : memref<1x8x2x16xf32, #tpu.memory_space<vmem>>, vector<1x8x2x16xf32>,
    return
  }
  func.func @transform_0(%arg0: i32) -> (i32, i32, i32, i32) {
    %c0_i32 = arith.constant 0 : i32
    %c0_i32_0 = arith.constant 0 : i32
    %c0_i32_1 = arith.constant 0 : i32
    %c0_i32_2 = arith.constant 0 : i32
    return %c0_i32, %c0_i32_0, %arg0, %c0_i32_1 : i32, i32, i32, i32
  }
  func.func @transform_1(%arg0: i32) -> (i32, i32, i32, i32) {
    %c0_i32 = arith.constant 0 : i32
    %c0_i32_0 = arith.constant 0 : i32
    %c0_i32_1 = arith.constant 0 : i32
    %c0_i32_2 = arith.constant 0 : i32
    return %c0_i32, %c0_i32_0, %arg0, %c0_i32_1 : i32, i32, i32, i32
  }
  func.func @transform_2(%arg0: i32) -> (i32, i32, i32, i32) {
    %c0_i32 = arith.constant 0 : i32
    %c0_i32_0 = arith.constant 0 : i32
    %c0_i32_1 = arith.constant 0 : i32
    %c0_i32_2 = arith.constant 0 : i32
    return %c0_i32, %c0_i32_0, %arg0, %c0_i32_1 : i32, i32, i32, i32
  }
  func.func @transform_3(%arg0: i32) -> (i32, i32, i32, i32) {
    %c0_i32 = arith.constant 0 : i32
    %c0_i32_0 = arith.constant 0 : i32
    %c0_i32_1 = arith.constant 0 : i32
    %c0_i32_2 = arith.constant 0 : i32
    return %c0_i32, %c0_i32_0, %arg0, %c0_i32_1 : i32, i32, i32, i32
  }
  func.func @transform_4(%arg0: i32) -> (i32, i32, i32) {
    %c0_i32 = arith.constant 0 : i32
    %c0_i32_0 = arith.constant 0 : i32
    %c0_i32_1 = arith.constant 0 : i32
    return %c0_i32, %arg0, %c0_i32_0 : i32, i32, i32
  }
  func.func @transform_5(%arg0: i32) -> (i32, i32, i32, i32) {
    %c0_i32 = arith.constant 0 : i32
    %c0_i32_0 = arith.constant 0 : i32
    %c0_i32_1 = arith.constant 0 : i32
    %c0_i32_2 = arith.constant 0 : i32
    return %arg0, %c0_i32, %c0_i32_0, %c0_i32_1 : i32, i32, i32, i32
  }
}

</mosaic_0001>

<bundles_post_ra>
// kernel: tpu_custom_call.1
= control target key start
LH: loop header
LB: loop body
LE: loop exit
PB: predicated region body
PF: predicated region fallthrough
CT: control target
= control target key end

     0   :  { %s1684_s0 = inlined_call_operand.hbm [shape: f32[2,2,16,16], index: 0, kind: input, shape index: {}]   ;;  %s1685_s1 = inlined_call_operand.hbm [shape: f32[2,2,16,16], index: 1, kind: input, shape index: {}]   ;;  %s1686_s2 = inlined_call_operand.hbm [shape: f32[2,2,16,16], index: 2, kind: input, shape index: {}]   ;;  %s1687_s3 = inlined_call_operand.hbm [shape: f32[2,2,16,16], index: 3, kind: input, shape index: {}]   ;;  %s1688_s4 = inlined_call_operand.hbm [shape: f32[2,16,16], index: 4, kind: input, shape index: {}]   ;;  %s1689_s5 = inlined_call_operand.hbm [shape: f32[2,8,2,16], index: 5, kind: output, shape index: {}]  }
   0x1   :  { %1703 = sst [smem:[#allocation20_spill]] %s1685_s1 }
   0x2   :  { %1704 = sst [smem:[#allocation21_spill]] %s1687_s3 }
   0x3   :  { %10 = vsyncpa [#allocation3], 0 }
   0x4   :  { %12 = vsyncpa [#allocation3 + $0x1], 0 }
   0x5   :  { %13 = vsyncpa [#allocation6], 0 }
   0x6   :  { %15 = vsyncpa [#allocation6 + $0x1], 0 }
   0x7   :  { %16 = vsyncpa [#allocation9], 0 }
   0x8   :  { %18 = vsyncpa [#allocation9 + $0x1], 0 }
   0x9   :  { %19 = vsyncpa [#allocation4], 0 }
   0xa   :  { %21 = vsyncpa [#allocation4 + $0x1], 0  ;;  %s1216_s18 = smov 0   ;;  %s1218_s19 = smov 0  }
   0xb   :  { %s1220_s20 = smov 0   ;;  %s1222_s21 = smov 0  }
   0xc LB: > { %1705 = sst [smem:[#allocation16_spill]] %s1168_s20  ;;  %s1237_s22 = sadd.s32 4294967295, %s1172_s21   ;;  %s1172_s21 = sphi %s1222_s21, %s1733_s21   ;;  %s1168_s20 = sphi %s1220_s20, %s1735_s20   ;;  %s1164_s19 = sphi %s1218_s19, %s1737_s19   ;;  %s1160_s18 = sphi %s1216_s18, %s1736_s18  }
   0xd   : > { %1706 = sst [smem:[#allocation17_spill]] %s1172_s21  ;;  %s836_s23 = sadd.s32 4294967294, %s1172_s21  }
   0xe   : > { %s1241_s24 = sadd.s32 1, %s1172_s21   ;;  %s34_s25 = sadd.s32 1, %s1168_s20 }
   0xf   : > { %1707 = sst [smem:[#allocation18_spill]] %s1241_s24  ;;  %s31_s26 = ssub.s32 %s1172_s21, %s1241_s24 }
  0x10   : > { %p41_p0 = scmp.ne.s32.totalorder %s1168_s20, %s1164_s19  ;;  %p32_p1 = scmp.eq.s32.totalorder %s31_s26, 0 }
  0x11   : > { %p42_p2 = scmp.eq.s32.totalorder %s1172_s21, 0  ;;  %p47_p3 = scmp.ne.s32.totalorder %s1164_s19, %s1160_s18 }
  0x12   : > { %p48_p4 = scmp.eq.s32.totalorder %s1237_s22, 0  ;;  %p175_p7 = scmp.eq.s32.totalorder %s1237_s22, 1 }
  0x13   : > { %s1253_s27 = scalar_select %p32_p1, %s1168_s20, %s34_s25  }
  0x14   : > { %p43_p5 = por %p42_p2, %p41_p0  ;;  %p1255_p6 = por %p48_p4, %p47_p3 }
  0x15   : > { %1708 = sst [smem:[#allocation19_spill]] %s1253_s27  ;;  %p181_p8 = scmp.eq.s32.totalorder %s836_s23, 1 }
  0x16   : > { %s1709_s28 = scalar_select %p1255_p6, 1, 0 }
  0x17   : > { %p904_p10 = scmp.lt.s32.totalorder %s1172_s21, 2  ;;  %p1262_p11 = por %p175_p7, %p41_p0 }
  0x18   : > { %p1266_p12 = por %p181_p8, %p47_p3  ;;  %s1271_s6 = sand.u32 1, %s1168_s20  }
  0x19   : > { %s1710_s29 = scalar_select %p1262_p11, 1, 0 }
  0x1a   : > { %s1711_s30 = scalar_select %p1266_p12, 1, 0 }
  0x1b   : > { %s1274_s7 = sshll.u32 %s1172_s21, 7  ;;  %s1277_s8 = sshll.u32 %s1271_s6, 5 }
  0x1c   : > { %p1279_p13 = pnand %p904_p10, %p43_p5  ;;  %s1690_s10 = sand.u32 1, %s1172_s21  }
  0x1d   : > { %s1713_s1 = sld [smem:[#allocation20_spill]]  ;;  %s225_s14 = scalar_lea.vmem [#allocation5], %s1277_s8 }
  0x1e   : > { %s231_s15 = sshll.u32 %s225_s14, 4  ;;  %s1297_s16 = scalar_lea.sflag [#allocation6], %s1690_s10  ;;  %s1292_s15 = int_to_ptr.vmem [resolvable:$true] %s231_s15 }
  0x1f   : > { %p1303_p3 = pneg %p1279_p13 }
  0x23   : > { %s1288_s13 = scalar_lea.hbm %s1713_s1, %s1274_s7  ;;  %s953_s11 = scalar_lea.hbm %s1713_s1, 1024 }
  0x24   : > { %s948_s17 = scalar_lea.hbm %s1288_s13, 512  ;;  %p954_p7 = scmp.lt.u32.totalorder %s1288_s13, %s1713_s1 }
  0x25   : > { %p949_p2 = scmp.ne.s32.totalorder %s1288_s13, %s948_s17  ;;  %p955_p8 = scmp.lt.u32.totalorder %s953_s11, %s948_s17 }
  0x26   : > { %p957_p9 = scmp.lt.u32.totalorder %s948_s17, %s1288_s13 }
  0x27   : > { %p951_p4 = pnand %p1303_p3, %p949_p2  ;;  %p956_p10 = por %p955_p8, %p954_p7 }
  0x29   : > { %p952_p5 = pneg %p951_p4  ;;  %p958_p0 = por %p957_p9, %p956_p10 }
  0x2b   : > { %p959_p1 = pnand %p958_p0, %p952_p5 }
  0x2d   : > { %962 = shalt.err (!%p959_p1)
}
  0x2e   : > { %s963_s10 = scalar_lea.vmem %s1292_s15, 512  ;;  %s1174_s25 = smov [#allocation5]  }
  0x2f   : > { %p964_p2 = scmp.ne.s32.totalorder %s1292_s15, %s963_s10  ;;  %s968_s26 = sshll.u32 %s1174_s25, 4  ;;  %s969_s26 = int_to_ptr.vmem [resolvable:$false] %s968_s26 }
  0x30   : > { %s970_s12 = scalar_lea.vmem %s969_s26, 1024  ;;  %p971_p11 = scmp.lt.s32.totalorder %s1292_s15, %s969_s26 }
  0x31   : > { %p966_p4 = pnand %p964_p2, %p1303_p3  ;;  %p972_p6 = scmp.lt.s32.totalorder %s970_s12, %s963_s10 }
  0x33   : > { %p967_p12 = pneg %p966_p4  ;;  %p973_p7 = por %p972_p6, %p971_p11 }
  0x35   : > { %p974_p8 = pnand %p973_p7, %p967_p12 }
  0x37   : > { %977 = shalt.err (!%p974_p8)
}
  0x38   : > { %s1693_s17 = smov 256   ;;  %s1695_s11 = smov 128  }
  0x39   : > { %s1697_s14 = smov 8   ;;  %p1715_p6 = scmp.lt.s32.totalorder %s1172_s21, 3 }
  0x3a   : > { %890 = dma.hbm_to_vmem [thread:$0]  (!%p1279_p13), %s1288_s13, 512, %s1292_s15, %s1297_s16, %s1693_s17, %s1695_s11, %s1697_s14  }
  0x3b   : > { %p1716_p9 = scmp.ge.s32.totalorder %s1172_s21, 1  ;;  %s1718_s3 = sld [smem:[#allocation21_spill]] }
  0x3c   : > { %s265_s1 = scalar_lea.vmem [#allocation8], %s1277_s8  ;;  %s1719_s13 = sand.u32 1, %s1172_s21  }
  0x3d   : > { %p1334_p11 = pnand %p1716_p9, %p1715_p6  ;;  %s271_s27 = sshll.u32 %s265_s1, 4  ;;  %s1345_s27 = int_to_ptr.vmem [resolvable:$true] %s271_s27 }
  0x3e   : > { %s1349_s15 = scalar_lea.sflag [#allocation9], %s1719_s13 }
  0x3f   : > { %s1717_s10 = scalar_select %p1334_p11, 1, 0 }
  0x41   : > { %s1342_s12 = scalar_lea.hbm %s1718_s3, %s1274_s7  ;;  %s983_s26 = scalar_lea.hbm %s1718_s3, 1024 }
  0x42   : > { %s978_s17 = scalar_lea.hbm %s1342_s12, 512  ;;  %p984_p5 = scmp.lt.u32.totalorder %s1342_s12, %s1718_s3 }
  0x43   : > { %p979_p12 = scmp.ne.s32.totalorder %s1342_s12, %s978_s17  ;;  %p985_p10 = scmp.lt.u32.totalorder %s983_s26, %s978_s17 }
  0x44   : > { %p987_p4 = scmp.lt.u32.totalorder %s978_s17, %s1342_s12 }
  0x45   : > { %p981_p0 = pnand %p979_p12, %p1303_p3  ;;  %p986_p2 = por %p985_p10, %p984_p5 }
  0x47   : > { %p982_p1 = pneg %p981_p0  ;;  %p988_p7 = por %p987_p4, %p986_p2 }
  0x49   : > { %p989_p8 = pnand %p988_p7, %p982_p1 }
  0x4b   : > { %992 = shalt.err (!%p989_p8)
}
  0x4c   : > { %s993_s1 = scalar_lea.vmem %s1345_s27, 512  ;;  %s1178_s11 = smov [#allocation8]  }
  0x4d   : > { %p994_p6 = scmp.ne.s32.totalorder %s1345_s27, %s993_s1  ;;  %s998_s13 = sshll.u32 %s1178_s11, 4  ;;  %s999_s13 = int_to_ptr.vmem [resolvable:$false] %s998_s13 }
  0x4e   : > { %s1000_s20 = scalar_lea.vmem %s999_s13, 1024  ;;  %p1001_p0 = scmp.lt.s32.totalorder %s1345_s27, %s999_s13 }
  0x4f   : > { %p996_p9 = pnand %p994_p6, %p1303_p3  ;;  %p1002_p11 = scmp.lt.s32.totalorder %s1000_s20, %s993_s1 }
  0x51   : > { %p997_p12 = pneg %p996_p9  ;;  %p1003_p5 = por %p1002_p11, %p1001_p0 }
  0x53   : > { %p1004_p10 = pnand %p1003_p5, %p997_p12 }
  0x55   : > { %1007 = shalt.err (!%p1004_p10)
}
  0x56   : > { %s1720_s17 = smov 8   ;;  %s1721_s14 = smov 128  }
  0x57   : > { %s1722_s25 = smov 256   ;;  %s1380_s1 = scalar_lea.hbm %s1684_s0, %s1274_s7 }
  0x58   : > { %896 = dma.hbm_to_vmem [thread:$0]  (!%p1279_p13), %s1342_s12, 512, %s1345_s27, %s1349_s15, %s1722_s25, %s1721_s14, %s1720_s17  }
  0x59   : > { %s205_s13 = scalar_lea.vmem [#allocation2], %s1277_s8  ;;  %s202_s3 = scalar_lea.sflag [#allocation3], %s1271_s6 }
  0x5a   : > { %s211_s20 = sshll.u32 %s205_s13, 4  ;;  %s1008_s24 = scalar_lea.hbm %s1380_s1, 512  ;;  %s1383_s20 = int_to_ptr.vmem [resolvable:$true] %s211_s20 }
  0x5b   : > { %p1009_p11 = scmp.ne.s32.totalorder %s1380_s1, %s1008_s24  ;;  %s1013_s26 = scalar_lea.hbm %s1684_s0, 1024 }
  0x5c   : > { %p1014_p4 = scmp.lt.u32.totalorder %s1380_s1, %s1684_s0  ;;  %p1015_p7 = scmp.lt.u32.totalorder %s1013_s26, %s1008_s24 }
  0x5d   : > { %p1011_p1 = pnand %p1009_p11, %p1303_p3  ;;  %p1017_p6 = scmp.lt.u32.totalorder %s1008_s24, %s1380_s1 }
  0x5e   : > { %p1016_p8 = por %p1015_p7, %p1014_p4 }
  0x5f   : > { %p1012_p2 = pneg %p1011_p1 }
  0x60   : > { %p1018_p9 = por %p1017_p6, %p1016_p8 }
  0x62   : > { %p1019_p12 = pnand %p1018_p9, %p1012_p2 }
  0x64   : > { %1022 = shalt.err (!%p1019_p12)
}
  0x65   : > { %s1023_s13 = scalar_lea.vmem %s1383_s20, 512  ;;  %s1179_s27 = smov [#allocation2]  }
  0x66   : > { %p1024_p0 = scmp.ne.s32.totalorder %s1383_s20, %s1023_s13  ;;  %s1028_s12 = sshll.u32 %s1179_s27, 4  ;;  %s1029_s12 = int_to_ptr.vmem [resolvable:$false] %s1028_s12 }
  0x67   : > { %s1030_s21 = scalar_lea.vmem %s1029_s12, 1024  ;;  %p1031_p11 = scmp.lt.s32.totalorder %s1383_s20, %s1029_s12 }
  0x68   : > { %p1026_p5 = pnand %p1024_p0, %p1303_p3  ;;  %p1032_p1 = scmp.lt.s32.totalorder %s1030_s21, %s1023_s13 }
  0x6a   : > { %p1027_p10 = pneg %p1026_p5  ;;  %p1033_p4 = por %p1032_p1, %p1031_p11 }
  0x6c   : > { %p1034_p7 = pnand %p1033_p4, %p1027_p10 }
  0x6e   : > { %1037 = shalt.err (!%p1034_p7)
}
  0x6f   : > { %887 = dma.hbm_to_vmem [thread:$0]  (!%p1279_p13), %s1380_s1, 512, %s1383_s20, %s202_s3, %s1722_s25, %s1721_s14, %s1720_s17  }
  0x70   : > { %s1416_s11 = scalar_lea.hbm %s1686_s2, %s1274_s7  ;;  %s245_s13 = scalar_lea.vmem [#allocation7], %s1277_s8 }
  0x71   : > { %s251_s27 = sshll.u32 %s245_s13, 4  ;;  %s847_s12 = sshll.u32 %s1271_s6, 4  ;;  %s1419_s27 = int_to_ptr.vmem [resolvable:$true] %s251_s27 }
  0x72   : > { %s1038_s21 = scalar_lea.hbm %s1416_s11, 512  ;;  %s1043_s20 = scalar_lea.hbm %s1686_s2, 1024 }
  0x73   : > { %p1039_p2 = scmp.ne.s32.totalorder %s1416_s11, %s1038_s21  ;;  %p1044_p9 = scmp.lt.u32.totalorder %s1416_s11, %s1686_s2 }
  0x74   : > { %p1045_p12 = scmp.lt.u32.totalorder %s1043_s20, %s1038_s21  ;;  %p1047_p5 = scmp.lt.u32.totalorder %s1038_s21, %s1416_s11 }
  0x75   : > { %p1041_p8 = pnand %p1039_p2, %p1303_p3 }
  0x76   : > { %p1046_p0 = por %p1045_p12, %p1044_p9 }
  0x77   : > { %p1042_p6 = pneg %p1041_p8 }
  0x78   : > { %p1048_p10 = por %p1047_p5, %p1046_p0 }
  0x7a   : > { %p1049_p11 = pnand %p1048_p10, %p1042_p6 }
  0x7c   : > { %1052 = shalt.err (!%p1049_p11)
}
  0x7d   : > { %s1053_s8 = scalar_lea.vmem %s1419_s27, 512  ;;  %s1180_s13 = smov [#allocation7]  }
  0x7e   : > { %p1054_p1 = scmp.ne.s32.totalorder %s1419_s27, %s1053_s8  ;;  %s1058_s3 = sshll.u32 %s1180_s13, 4  ;;  %s1059_s3 = int_to_ptr.vmem [resolvable:$false] %s1058_s3 }
  0x7f   : > { %s1060_s1 = scalar_lea.vmem %s1059_s3, 1024  ;;  %p1061_p2 = scmp.lt.s32.totalorder %s1419_s27, %s1059_s3 }
  0x80   : > { %p1056_p4 = pnand %p1054_p1, %p1303_p3  ;;  %p1062_p8 = scmp.lt.s32.totalorder %s1060_s1, %s1053_s8 }
  0x82   : > { %p1057_p7 = pneg %p1056_p4  ;;  %p1063_p9 = por %p1062_p8, %p1061_p2 }
  0x84   : > { %p1064_p12 = pnand %p1063_p9, %p1057_p7 }
  0x86   : > { %1067 = shalt.err (!%p1064_p12)
}
  0x87   : > { %893 = dma.hbm_to_vmem [thread:$0]  (!%p1279_p13), %s1416_s11, 512, %s1419_s27, %s1297_s16, %s1722_s25, %s1721_s14, %s1720_s17  }
  0x88   : > { %s1451_s24 = scalar_lea.hbm %s1688_s4, %s1274_s7  ;;  %s285_s26 = scalar_lea.vmem [#allocation10], %s847_s12 }
  0x89   : > { %s291_s8 = sshll.u32 %s285_s26, 4  ;;  %s1068_s13 = scalar_lea.hbm %s1451_s24, 256  ;;  %s1455_s8 = int_to_ptr.vmem [resolvable:$true] %s291_s8 }
  0x8a   : > { %p1069_p6 = scmp.ne.s32.totalorder %s1451_s24, %s1068_s13  ;;  %s1073_s27 = scalar_lea.hbm %s1688_s4, 512 }
  0x8b   : > { %p1074_p10 = scmp.lt.u32.totalorder %s1451_s24, %s1688_s4  ;;  %p1075_p11 = scmp.lt.u32.totalorder %s1073_s27, %s1068_s13 }
  0x8c   : > { %p1071_p0 = pnand %p1069_p6, %p1303_p3  ;;  %p1077_p4 = scmp.lt.u32.totalorder %s1068_s13, %s1451_s24 }
  0x8d   : > { %p1076_p1 = por %p1075_p11, %p1074_p10 }
  0x8e   : > { %p1072_p5 = pneg %p1071_p0 }
  0x8f   : > { %p1078_p7 = por %p1077_p4, %p1076_p1 }
  0x91   : > { %p1079_p2 = pnand %p1078_p7, %p1072_p5 }
  0x93   : > { %1082 = shalt.err (!%p1079_p2)
}
  0x94   : > { %s1083_s6 = scalar_lea.vmem %s1455_s8, 256  ;;  %s1181_s12 = smov [#allocation10]  }
  0x95   : > { %p1084_p8 = scmp.ne.s32.totalorder %s1455_s8, %s1083_s6  ;;  %s1088_s1 = sshll.u32 %s1181_s12, 4  ;;  %s1089_s1 = int_to_ptr.vmem [resolvable:$false] %s1088_s1 }
  0x96   : > { %s1090_s21 = scalar_lea.vmem %s1089_s1, 512  ;;  %p1091_p6 = scmp.lt.s32.totalorder %s1455_s8, %s1089_s1 }
  0x97   : > { %p1086_p9 = pnand %p1084_p8, %p1303_p3  ;;  %p1092_p0 = scmp.lt.s32.totalorder %s1090_s21, %s1083_s6 }
  0x99   : > { %p1087_p12 = pneg %p1086_p9  ;;  %p1093_p10 = por %p1092_p0, %p1091_p6 }
  0x9b   : > { %p1094_p11 = pnand %p1093_p10, %p1087_p12 }
  0x9d   : > { %1097 = shalt.err (!%p1094_p11)
}
  0x9e   : > { %899 = dma.hbm_to_vmem [thread:$0]  (!%p1279_p13), %s1451_s24, 256, %s1455_s8, %s1349_s15, %s1722_s25, %s1721_s14, %s1720_s17  }
  0x9f   : > { %p1723_p3 = scmp.ne.s32.totalorder %s1717_s10, 0 }
  0xa0   : > { %s1485_s23 = sand.u32 (!%p1723_p3), 1, %s1164_s19   ;;  %p1724_p5 = scmp.ne.s32.totalorder (!%p1723_p3), %s1709_s28, 0 }
  0xa1   : > { %303 = sbr.rel (%p1723_p3) target bundleno = 252 (0xfc), region = 40  ;;  %s850_s20 = sshll.u32 (!%p1723_p3), %s1485_s23, 5 }
  0xa2   : > { %s306_s26 = scalar_lea.sflag (!%p1723_p3), [#allocation3], %s1485_s23  ;;  %s1489_s13 = scalar_lea.vmem (!%p1723_p3), [#allocation2], %s850_s20 }
  0xa8   : > { %1143 = dma.done.wait (%p1724_p5), %s306_s26, 512  }
  0xa9   : > { %1145 = vsyncadd (%p1724_p5), %s306_s26, 4294966784  ;;  %s314_s9 = sand.u32 1, %s1237_s22   ;;  %s1496_s15 = scalar_lea.vmem [#allocation5], %s850_s20 }
  0xaa   : > { %s315_s10 = scalar_lea.sflag [#allocation6], %s314_s9 }
  0xab   : > { %1147 = dma.done.wait (%p1724_p5), %s315_s10, 1024  }
  0xac   : > { %1149 = vsyncadd (%p1724_p5), %s315_s10, 4294966272  ;;  %s1502_s17 = scalar_lea.vmem [#allocation7], %s850_s20  ;;  %s333_s14 = scalar_lea.sflag [#allocation9], %s314_s9 }
  0xad   : > { %s336_s25 = scalar_lea.vmem [#allocation8], %s850_s20 }
  0xae   : > { %1151 = dma.done.wait (%p1724_p5), %s333_s14, 768  }
  0xaf   : > { %1153 = vsyncadd (%p1724_p5), %s333_s14, 4294966528  ;;  %s854_s24 = sshll.u32 %s1485_s23, 4  ;;  %v392_v0 = vld [vmem:[%s336_s25] sm:$0xff]  ;;  %v393_v1 = vld [vmem:[%s336_s25 + $0x10] sm:$0xff]  ;;  %vm432_vm0 = vcmask 130048   ;;  %vm630_vm7 = vcmask 1041409  }
  0xb0   : > { %v856_v2 = vld [vmem:[%s336_s25 + $0x8] sm:$0xff]  ;;  %v857_v3 = vld [vmem:[%s336_s25 + $0x18] sm:$0xff]  ;;  %s345_s8 = scalar_lea.vmem [#allocation10], %s854_s24  ;;  %v399_v6 = vmul.f32 %v392_v0, %v392_v0  ;;  %v400_v7 = vmul.f32 %v393_v1, %v393_v1  ;;  %v415_v10 = vld [vmem:[%s1489_s13] sm:$0xff]  ;;  %vm654_vm8 = vcmask 123904   ;;  %s1568_s28 = scalar_lea.vmem [#allocation11], %s854_s24 }
  0xb1   : > { %v397_v4 = vld [vmem:[%s345_s8] sm:$0xff]  ;;  %v398_v5 = vld [vmem:[%s345_s8 + $0x8] sm:$0xff]  ;;  %v401_v8 = vmul.f32 %v856_v2, %v856_v2  ;;  %v402_v9 = vmul.f32 %v857_v3, %v857_v3  ;;  %v420_v15 = vsub.f32 %v415_v10, %v392_v0  ;;  %s677_s16 = sshll.u32 %s1568_s28, 4  ;;  %s871_s11 = sshll.u32 %s1237_s22, 8  ;;  %s1629_s16 = int_to_ptr.vmem [resolvable:$true] %s677_s16 }
  0xb2   : > { %vm405_vm1 = vcmp.ge.f32.partialorder %v397_v4, 0.5  ;;  %vm406_vm2 = vcmp.ge.f32.partialorder %v398_v5, 0.5  ;;  %v416_v11 = vld [vmem:[%s1489_s13 + $0x10] sm:$0xff]  ;;  %v860_v12 = vld [vmem:[%s1489_s13 + $0x8] sm:$0xff]  ;;  %v861_v14 = vld [vmem:[%s1489_s13 + $0x18] sm:$0xff]  ;;  %s1634_s3 = scalar_lea.hbm %s1689_s5, %s871_s11  ;;  %s664_s22 = scalar_lea.sflag [#allocation4], %s1485_s23 }
  0xb3   : > { %v403_v13 = vadd.f32 %v401_v8, %v399_v6  ;;  %v421_v16 = vsub.f32 %v416_v11, %v393_v1  ;;  %v422_v17 = vsub.f32 %v860_v12, %v856_v2  ;;  %v447_v18 = vld [vmem:[%s1496_s15] sm:$0xff]  ;;  %v448_v19 = vld [vmem:[%s1496_s15 + $0x10] sm:$0xff]  ;;  %v404_v20 = vadd.f32 %v402_v9, %v400_v7  ;;  %v862_v22 = vld [vmem:[%s1496_s15 + $0x8] sm:$0xff]  ;;  %s1098_s6 = scalar_lea.vmem %s1629_s16, 256  ;;  %p1729_p1 = scmp.ne.s32.totalorder %s1710_s29, 0 }
  0xb4   : > { %v423_v21 = vsub.f32 %v861_v14, %v857_v3  ;;  %v863_v23 = vld [vmem:[%s1496_s15 + $0x18] sm:$0xff]  ;;  %v452_v24 = vsub.f32 %v447_v18, %v392_v0  ;;  %v453_v25 = vsub.f32 %v448_v19, %v393_v1  ;;  %v478_v26 = vld [vmem:[%s1502_s17] sm:$0xff]  ;;  %v424_v27 = vand.u32 2147483647, %v420_v15  ;;  %v479_v30 = vld [vmem:[%s1502_s17 + $0x10] sm:$0xff]  ;;  %p1099_p13 = scmp.ne.s32.totalorder %s1629_s16, %s1098_s6  ;;  %s1183_s12 = smov [#allocation11]  }
  0xb5   : > { %vm407_vm3 = vcmp.lt.f32.partialorder %v403_v13, 160000.0  ;;  %v425_v28 = vand.u32 2147483647, %v421_v16  ;;  %v454_v29 = vsub.f32 %v862_v22, %v856_v2  ;;  %vm408_vm4 = vcmp.lt.f32.partialorder %v404_v20, 160000.0  ;;  %v864_v35 = vld [vmem:[%s1502_s17 + $0x8] sm:$0xff]  ;;  %v865_v44 = vld [vmem:[%s1502_s17 + $0x18] sm:$0xff] }
  0xb6   : > { %vm1522_vm5 = vmand %vm405_vm1, %vm407_vm3  ;;  %v426_v32 = vand.u32 2147483647, %v422_v17  ;;  %v427_v33 = vand.u32 2147483647, %v423_v21  ;;  %v455_v34 = vsub.f32 %v863_v23, %v857_v3  ;;  %v456_v37 = vand.u32 2147483647, %v452_v24  ;;  %p1100_p4 = pnand %p1099_p13, %p1729_p1 }
  0xb7   : > { %vm1528_vm6 = vmand %vm406_vm2, %vm408_vm4  ;;  %v457_v38 = vand.u32 2147483647, %v453_v25  ;;  %v458_v39 = vand.u32 2147483647, %v454_v29  ;;  %v483_v40 = vsub.f32 %v478_v26, %v392_v0  ;;  %v484_v45 = vsub.f32 %v479_v30, %v393_v1  ;;  %s1102_s1 = sshll.u32 %s1183_s12, 4  ;;  %s1103_s1 = int_to_ptr.vmem [resolvable:$false] %s1102_s1 }
  0xb8   : > { %v428_v41 = vadd.f32 %v426_v32, %v424_v27  ;;  %v429_v42 = vadd.f32 %v427_v33, %v425_v28  ;;  %v459_v43 = vand.u32 2147483647, %v455_v34  ;;  %v485_v47 = vsub.f32 %v864_v35, %v856_v2  ;;  %p1101_p7 = pneg %p1100_p4  ;;  %s1104_s21 = scalar_lea.vmem %s1103_s1, 512 }
  0xb9   : > { %v460_v46 = vadd.f32 %v458_v39, %v456_v37  ;;  %v486_v48 = vsub.f32 %v865_v44, %v857_v3  ;;  %v487_v49 = vand.u32 2147483647, %v483_v40  ;;  %v488_v53 = vand.u32 2147483647, %v484_v45  ;;  %p1105_p2 = scmp.lt.s32.totalorder %s1629_s16, %s1103_s1  ;;  %p1106_p8 = scmp.lt.s32.totalorder %s1104_s21, %s1098_s6 }
  0xba   : > { %v430_v50 = vsel %vm1522_vm5, %v428_v41, 0.0  ;;  %v431_v51 = vsel %vm1528_vm6, %v429_v42, 0.0  ;;  %v461_v52 = vadd.f32 %v459_v43, %v457_v38  ;;  %v489_v57 = vand.u32 2147483647, %v485_v47 }
  0xbb   : > { %v433_v54 = vsel %vm432_vm0, %v430_v50, 0.0  ;;  %v440_v55 = vsel %vm432_vm0, %v431_v51, 0.0  ;;  %v462_v56 = vsel %vm1522_vm5, %v460_v46, 0.0  ;;  %v490_v0 = vand.u32 2147483647, %v486_v48  ;;  %p1107_p9 = por %p1106_p8, %p1105_p2 }
  0xbc   : > { %v434_v58 = vrot.slane %v433_v54, 4  ;;  %v441_v59 = vrot.slane %v440_v55, 4  ;;  %v463_v60 = vsel %vm1528_vm6, %v461_v52, 0.0  ;;  %v464_v61 = vsel %vm432_vm0, %v462_v56, 0.0 }
  0xbd   : > { %v465_v62 = vrot.slane %v464_v61, 4  ;;  %v471_v63 = vsel %vm432_vm0, %v463_v60, 0.0  ;;  %v491_v1 = vadd.f32 %v489_v57, %v487_v49  ;;  %v509_v5 = vmul.f32 %v483_v40, %v483_v40  ;;  %p1108_p12 = pnand %p1107_p9, %p1101_p7 }
  0xbe   : > { %v435_v2 = vadd.f32 %v434_v58, %v433_v54  ;;  %v442_v3 = vadd.f32 %v441_v59, %v440_v55  ;;  %v472_v4 = vrot.slane %v471_v63, 4  ;;  %v492_v7 = vadd.f32 %v490_v0, %v488_v53 }
  0xbf   : > { %v466_v6 = vadd.f32 %v465_v62, %v464_v61  ;;  %v493_v8 = vsel %vm1522_vm5, %v491_v1, 0.0  ;;  %v510_v9 = vmul.f32 %v484_v45, %v484_v45  ;;  %v511_v17 = vmul.f32 %v485_v47, %v485_v47 }
  0xc0   : > { %v436_v10 = vrot.slane %v435_v2, 2  ;;  %v443_v11 = vrot.slane %v442_v3, 2  ;;  %v473_v12 = vadd.f32 %v472_v4, %v471_v63  ;;  %v495_v13 = vsel %vm432_vm0, %v493_v8, 0.0 }
  0xc1   : > { %v467_v14 = vrot.slane %v466_v6, 2  ;;  %v494_v15 = vsel %vm1528_vm6, %v492_v7, 0.0  ;;  %v496_v16 = vrot.slane %v495_v13, 4  ;;  %v512_v25 = vmul.f32 %v486_v48, %v486_v48 }
  0xc2   : > { %v437_v18 = vadd.f32 %v436_v10, %v435_v2  ;;  %v444_v19 = vadd.f32 %v443_v11, %v442_v3  ;;  %v474_v20 = vrot.slane %v473_v12, 2  ;;  %v502_v21 = vsel %vm432_vm0, %v494_v15, 0.0 }
  0xc3   : > { %v468_v22 = vadd.f32 %v467_v14, %v466_v6  ;;  %v497_v23 = vadd.f32 %v496_v16, %v495_v13  ;;  %v503_v24 = vrot.slane %v502_v21, 4  ;;  %v1551_v29 = vadd.f32 %v511_v17, %v509_v5 }
  0xc4   : > { %v438_v26 = vrot.slane %v437_v18, 1  ;;  %v445_v27 = vrot.slane %v444_v19, 1  ;;  %v475_v28 = vadd.f32 %v474_v20, %v473_v12  ;;  %v1553_v34 = vadd.f32 %v512_v25, %v510_v9 }
  0xc5   : > { %v469_v30 = vrot.slane %v468_v22, 1  ;;  %v498_v32 = vrot.slane %v497_v23, 2  ;;  %v504_v33 = vadd.f32 %v503_v24, %v502_v21  ;;  %v1182_v39 = vmov 0.0  }
  0xc6   : > { %v439_v35 = vadd.f32 %v438_v26, %v437_v18  ;;  %v446_v37 = vadd.f32 %v445_v27, %v444_v19  ;;  %v476_v38 = vrot.slane %v475_v28, 1  ;;  %v858_v40 = vsel %vm1522_vm5, 1.0, %v1182_v39 }
  0xc7   : > { %v470_v41 = vadd.f32 %v469_v30, %v468_v22  ;;  %v499_v42 = vadd.f32 %v498_v32, %v497_v23  ;;  %v505_v43 = vrot.slane %v504_v33, 2  ;;  %v1559_v44 = vsel %vm1528_vm6, 1.0, %v1182_v39 }
  0xc8   : > { %v629_v45 = vrot.slane %v446_v37, 7  ;;  %v477_v46 = vadd.f32 %v476_v38, %v475_v28  ;;  %v529_v47 = vsel %vm432_vm0, %v858_v40, 0.0  ;;  %v536_v48 = vsel %vm432_vm0, %v1559_v44, 0.0 }
  0xc9   : > { %v500_v49 = vrot.slane %v499_v42, 1  ;;  %v506_v50 = vadd.f32 %v505_v43, %v504_v33  ;;  %v530_v51 = vrot.slane %v529_v47, 4  ;;  %v537_v52 = vrot.slane %v536_v48, 4 }
  0xca   : > { %v631_v53 = vsel %vm630_vm7, %v629_v45, %v439_v35  ;;  %v632_v54 = vrot.slane %v477_v46, 7  ;;  %944 = vrsqrt.f32 %v1551_v29  ;;  %vm517_vm9 = vcmp.eq.f32.partialorder %v1551_v29, inf }
  0xcb   : > { %655 = vst.msk [vmem:[%s1568_s28] sm:$0x3] %vm654_vm8, %v631_v53  ;;  %v507_v55 = vrot.slane %v506_v50, 1  ;;  %v531_v56 = vadd.f32 %v530_v51, %v529_v47  ;;  %v538_v57 = vadd.f32 %v537_v52, %v536_v48  ;;  %v501_v59 = vadd.f32 %v500_v49, %v499_v42 }
  0xcc   : > { %v633_v58 = vsel %vm630_vm7, %v632_v54, %v470_v41  ;;  %946 = vrsqrt.f32 %v1553_v34  ;;  %vm519_vm10 = vcmp.eq.f32.partialorder %v1551_v29, 0.0  ;;  %v520_v63 = vand.u32 2147483648, %v1551_v29 }
  0xcd   : > { %656 = vst.msk [vmem:[%s1568_s28 + $0x2] sm:$0x3] %vm654_vm8, %v633_v58  ;;  %v508_v60 = vadd.f32 %v507_v55, %v506_v50  ;;  %v532_v61 = vrot.slane %v531_v56, 2  ;;  %v539_v62 = vrot.slane %v538_v57, 2  ;;  %vm524_vm11 = vcmp.eq.f32.partialorder %v1553_v34, inf }
  0xce   : > { %v527_v0 = vand.u32 2147483648, %v1553_v34  ;;  %vm559_vm12 = vcmp.lt.f32.partialorder %v1551_v29, 1.0  ;;  %vm560_vm13 = vcmp.lt.f32.partialorder %v1553_v34, 1.0  ;;  %vm526_vm14 = vcmp.eq.f32.partialorder %v1553_v34, 0.0 }
  0xcf   : > { %v634_v1 = vrot.slane %v508_v60, 7  ;;  %v533_v2 = vadd.f32 %v532_v61, %v531_v56  ;;  %v540_v3 = vadd.f32 %v539_v62, %v538_v57  ;;  %v561_v4 = vsel %vm559_vm12, %v858_v40, 0.0 }
  0xd0   : > { %v562_v5 = vsel %vm560_vm13, %v1559_v44, 0.0  ;;  %v563_v6 = vsel %vm432_vm0, %v561_v4, 0.0  ;;  %vm577_vm15 = vcmp.lt.f32.partialorder %v1551_v29, 9.0  ;;  %vm578_vm1 = vcmp.lt.f32.partialorder %v1553_v34, 9.0 }
  0xd1   : > { %v635_v7 = vsel %vm630_vm7, %v634_v1, %v501_v59  ;;  %v534_v8 = vrot.slane %v533_v2, 1  ;;  %v541_v9 = vrot.slane %v540_v3, 1  ;;  %v564_v10 = vrot.slane %v563_v6, 4 }
  0xd2   : > { %657 = vst.msk [vmem:[%s1568_s28 + $0x4] sm:$0x3] %vm654_vm8, %v635_v7  ;;  %v570_v11 = vsel %vm432_vm0, %v562_v5, 0.0  ;;  %v579_v12 = vsel %vm577_vm15, %v858_v40, 0.0  ;;  %v580_v13 = vsel %vm578_vm1, %v1559_v44, 0.0  ;;  %vm595_vm2 = vcmp.lt.f32.partialorder %v1551_v29, 25.0 }
  0xd3   : > { %v535_v14 = vadd.f32 %v534_v8, %v533_v2  ;;  %v542_v15 = vadd.f32 %v541_v9, %v540_v3  ;;  %v565_v16 = vadd.f32 %v564_v10, %v563_v6  ;;  %v571_v17 = vrot.slane %v570_v11, 4 }
  0xd4   : > { %v945_v18 = vpop.eup %944  ;;  %v581_v19 = vsel %vm432_vm0, %v579_v12, 0.0  ;;  %v588_v20 = vsel %vm432_vm0, %v580_v13, 0.0  ;;  %vm596_vm3 = vcmp.lt.f32.partialorder %v1553_v34, 25.0  ;;  %v597_v21 = vsel %vm595_vm2, %v858_v40, 0.0 }
  0xd5   : > { %v636_v22 = vrot.slane %v542_v15, 7  ;;  %v516_v23 = vmul.f32 %v945_v18, %v1551_v29  ;;  %v566_v24 = vrot.slane %v565_v16, 2  ;;  %v572_v25 = vadd.f32 %v571_v17, %v570_v11 }
  0xd6   : > { %v947_v26 = vpop.eup %946  ;;  %v582_v27 = vrot.slane %v581_v19, 4  ;;  %v589_v28 = vrot.slane %v588_v20, 4  ;;  %v598_v30 = vsel %vm596_vm3, %v1559_v44, 0.0  ;;  %v599_v32 = vsel %vm432_vm0, %v597_v21, 0.0 }
  0xd7   : > { %v637_v33 = vsel %vm630_vm7, %v636_v22, %v535_v14  ;;  %v518_v35 = vsel %vm517_vm9, %v1551_v29, %v516_v23  ;;  %v523_v37 = vmul.f32 %v947_v26, %v1553_v34  ;;  %v567_v38 = vadd.f32 %v566_v24, %v565_v16 }
  0xd8   : > { %658 = vst.msk [vmem:[%s1568_s28 + $0x6] sm:$0x3] %vm654_vm8, %v637_v33  ;;  %v521_v39 = vsel %vm519_vm10, %v520_v63, %v518_v35  ;;  %v573_v40 = vrot.slane %v572_v25, 2  ;;  %v583_v41 = vadd.f32 %v582_v27, %v581_v19  ;;  %v590_v42 = vadd.f32 %v589_v28, %v588_v20 }
  0xd9   : > { %v525_v43 = vsel %vm524_vm11, %v1553_v34, %v523_v37  ;;  %v543_v44 = vsel %vm1522_vm5, %v521_v39, 0.0  ;;  %v568_v45 = vrot.slane %v567_v38, 1  ;;  %v600_v46 = vrot.slane %v599_v32, 4 }
  0xda   : > { %v528_v47 = vsel %vm526_vm14, %v527_v0, %v525_v43  ;;  %v545_v48 = vsel %vm432_vm0, %v543_v44, 0.0  ;;  %v574_v49 = vadd.f32 %v573_v40, %v572_v25  ;;  %v584_v29 = vrot.slane %v583_v41, 2 }
  0xdb   : > { %v544_v50 = vsel %vm1528_vm6, %v528_v47, 0.0  ;;  %v546_v51 = vrot.slane %v545_v48, 4  ;;  %v569_v52 = vadd.f32 %v568_v45, %v567_v38  ;;  %v591_v53 = vrot.slane %v590_v42, 2 }
  0xdc   : > { %v552_v54 = vsel %vm432_vm0, %v544_v50, 0.0  ;;  %v575_v55 = vrot.slane %v574_v49, 1  ;;  %v585_v31 = vadd.f32 %v584_v29, %v583_v41  ;;  %v601_v56 = vadd.f32 %v600_v46, %v599_v32 }
  0xdd   : > { %v547_v57 = vadd.f32 %v546_v51, %v545_v48  ;;  %v553_v58 = vrot.slane %v552_v54, 4  ;;  %v592_v59 = vadd.f32 %v591_v53, %v590_v42  ;;  %v606_v34 = vsel %vm432_vm0, %v598_v30, 0.0 }
  0xde   : > { %v576_v60 = vadd.f32 %v575_v55, %v574_v49  ;;  %v586_v61 = vrot.slane %v585_v31, 1  ;;  %v602_v62 = vrot.slane %v601_v56, 2  ;;  %v607_v63 = vrot.slane %v606_v34, 4 }
  0xdf   : > { %v548_v36 = vrot.slane %v547_v57, 2  ;;  %v554_v0 = vadd.f32 %v553_v58, %v552_v54  ;;  %v593_v1 = vrot.slane %v592_v59, 1 }
  0xe0   : > { %v640_v2 = vrot.slane %v576_v60, 7  ;;  %v603_v3 = vadd.f32 %v602_v62, %v601_v56  ;;  %v608_v4 = vadd.f32 %v607_v63, %v606_v34  ;;  %v587_v7 = vadd.f32 %v586_v61, %v585_v31 }
  0xe1   : > { %v549_v5 = vadd.f32 %v548_v36, %v547_v57  ;;  %v555_v6 = vrot.slane %v554_v0, 2  ;;  %v594_v8 = vadd.f32 %v593_v1, %v592_v59 }
  0xe2   : > { %v641_v9 = vsel %vm630_vm7, %v640_v2, %v569_v52  ;;  %v609_v10 = vrot.slane %v608_v4, 2  ;;  %v604_v14 = vrot.slane %v603_v3, 1 }
  0xe3   : > { %v550_v11 = vrot.slane %v549_v5, 1  ;;  %v556_v12 = vadd.f32 %v555_v6, %v554_v0  ;;  %660 = vst.msk [vmem:[%s1568_s28 + $0xa] sm:$0x3] %vm654_vm8, %v641_v9  ;;  %v642_v13 = vrot.slane %v594_v8, 7 }
  0xe4   : > { %v610_v15 = vadd.f32 %v609_v10, %v608_v4  ;;  %v605_v21 = vadd.f32 %v604_v14, %v603_v3 }
  0xe5   : > { %v557_v16 = vrot.slane %v556_v12, 1  ;;  %v643_v17 = vsel %vm630_vm7, %v642_v13, %v587_v7  ;;  %v551_v19 = vadd.f32 %v550_v11, %v549_v5 }
  0xe6   : > { %661 = vst.msk [vmem:[%s1568_s28 + $0xc] sm:$0x3] %vm654_vm8, %v643_v17  ;;  %v611_v18 = vrot.slane %v610_v15, 1 }
  0xe7   : > { %v558_v20 = vadd.f32 %v557_v16, %v556_v12 }
  0xe8   : > { %v612_v22 = vadd.f32 %v611_v18, %v610_v15 }
  0xe9   : > { %v638_v23 = vrot.slane %v558_v20, 7 }
  0xea   : > { %v644_v24 = vrot.slane %v612_v22, 7 }
  0xeb   : > { %v639_v25 = vsel %vm630_vm7, %v638_v23, %v551_v19 }
  0xec   : > { %659 = vst.msk [vmem:[%s1568_s28 + $0x8] sm:$0x3] %vm654_vm8, %v639_v25  ;;  %v645_v26 = vsel %vm630_vm7, %v644_v24, %v605_v21 }
  0xed   : > { %662 = vst.msk [vmem:[%s1568_s28 + $0xe] sm:$0x3] %vm654_vm8, %v645_v26 }
  0xee   : > { %1111 = shalt.err (!%p1108_p12)
}
  0xef   : > { %s1112_s20 = scalar_lea.hbm %s1634_s3, 256  ;;  %s1116_s9 = scalar_lea.hbm %s1689_s5, 512 }
  0xf0   : > { %p1113_p6 = scmp.ne.s32.totalorder %s1634_s3, %s1112_s20  ;;  %p1117_p11 = scmp.lt.u32.totalorder %s1634_s3, %s1689_s5 }
  0xf1   : > { %p1118_p3 = scmp.lt.u32.totalorder %s1116_s9, %s1112_s20  ;;  %p1120_p13 = scmp.lt.u32.totalorder %s1112_s20, %s1634_s3 }
  0xf2   : > { %p1114_p0 = pnand %p1113_p6, %p1729_p1 }
  0xf3   : > { %p1119_p5 = por %p1118_p3, %p1117_p11 }
  0xf4   : > { %p1115_p10 = pneg %p1114_p0 }
  0xf5   : > { %p1121_p4 = por %p1120_p13, %p1119_p5 }
  0xf7   : > { %p1122_p7 = pnand %p1121_p4, %p1115_p10 }
  0xf9   : > { %1125 = shalt.err (!%p1122_p7)
}
  0xfa   : > { %s1184_s17 = smov 32   ;;  %s1185_s14 = smov 2  }
  0xfb   : > { %882 = dma.vmem_to_hbm [thread:$0]  (%p1729_p1), %s1629_s16, 256, %s1634_s3, %s664_s22, %s1184_s17, %s1184_s17, %s1185_s14  }
  0xfc PF: > { %s1730_s25 = sld [smem:[#allocation17_spill]]  ;;  %s692_s24 = sand.u32 1, %s1160_s18  }
  0xfd   : > { %p1731_p2 = scmp.ne.s32.totalorder %s1711_s30, 0  ;;  %s693_s8 = scalar_lea.sflag [#allocation4], %s692_s24 }
 0x102   : > { %p1732_p8 = scmp.ge.s32.totalorder %s1730_s25, 2 }
 0x104   : > { %p901_p9 = pnand %p1732_p8, %p1731_p2 }
 0x106   : > { %1155 = dma.done.wait (!%p901_p9), %s693_s8, 256  }
 0x107   : > { %1157 = vsyncadd (!%p901_p9), %s693_s8, 4294967040  ;;  %s1733_s21 = sld [smem:[#allocation18_spill]]  ;;  %s1734_s28 = sld [smem:[#allocation16_spill]] }
 0x108   : > { %s1735_s20 = sld [smem:[#allocation19_spill]]  ;;  %s1736_s18 = smov %s1164_s19 }
 0x10d   : > { %p24_p12 = scmp.ge.s32.totalorder %s1733_s21, 4   ;;  %s1737_s19 = smov %s1734_s28 }
 0x10f   :  { %26 = sbr.rel (!%p24_p12) target bundleno = 12 (0xc), region = 137 }
 0x116   :  { %698 = vsyncpa [#allocation3], 1 }
 0x117   :  { %700 = vsyncpa [#allocation3 + $0x1], 1 }
 0x118   :  { %701 = vsyncpa [#allocation6], 1 }
 0x119   :  { %703 = vsyncpa [#allocation6 + $0x1], 1 }
 0x11a   :  { %704 = vsyncpa [#allocation9], 1 }
 0x11b   :  { %706 = vsyncpa [#allocation9 + $0x1], 1 }
 0x11c   :  { %707 = vsyncpa [#allocation4], 1 }
 0x11d   :  { %709 = vsyncpa [#allocation4 + $0x1], 1 }

</bundles_post_ra>
